<compile_context>
chip_gen: v6e
topology: v6e:2x2x1
jax: 0.10.0
libtpu: 0.0.40
codegen_flags: <defaults>
</compile_context>

<pallas_src>
import functools

import jax
import jax.numpy as jnp
from jax.experimental import pallas as pl
from jax.experimental.pallas import tpu as pltpu


def _round_up(x, m):
    return ((x + m - 1) // m) * m


def _gce_kernel(yhat_ref, y_ref, out_ref, *, batch, rows, need_mask):
    # yhat_ref: (3, rows, N) native dtype  -- three sublane/lane-dense class planes
    # y_ref:    (rows, N)   int8/int32 labels
    # out_ref:  (1, 1, N)   float32       -- per-lane partial sum for this block
    l0 = yhat_ref[0].astype(jnp.float32)            # (rows, N)
    l1 = yhat_ref[1].astype(jnp.float32)
    l2 = yhat_ref[2].astype(jnp.float32)
    labels = y_ref[...].astype(jnp.int32)           # (rows, N)

    # numerically-stable logsumexp over the (fully unrolled) 3-class axis -- pure VPU/EUP work
    m = jnp.maximum(jnp.maximum(l0, l1), l2)
    lse = m + jnp.log(jnp.exp(l0 - m) + jnp.exp(l1 - m) + jnp.exp(l2 - m))

    # gather the target-class logit with elementwise selects (no one-hot, no class-axis reduce)
    picked = jnp.where(labels == 0, l0, jnp.where(labels == 1, l1, l2))
    nll = lse - picked                              # (rows, N)

    if need_mask:
        # Ragged last block: batch rows >= `batch` are Pallas edge-block garbage; zero them
        # before the reduction.  (int32 row index is fine for any realistic batch size.)
        row = pl.program_id(0) * rows + jax.lax.broadcasted_iota(jnp.int32, nll.shape, 0)
        nll = jnp.where(row < batch, nll, 0.0)

    # sublane-only reduction -> lane-dense (1, N) partial; the wrapper finishes the lane sum
    out_ref[...] = jnp.sum(nll, axis=0, keepdims=True)[None]


def _choose_rows(batch):
    """Batch rows per grid step: big enough to hide per-step overhead, >=2 blocks for v7x."""
    if batch <= 32:
        return batch, False                              # one full-extent block (always legal)
    rows = min(512, _round_up(pl.cdiv(batch, 2), 32))    # multiple of 32 (int8-tile friendly)
    return rows, batch % rows != 0


def global_cross_entropy(y_hat, y):
    """y_hat: (B, N, 3) float (any dtype); y: (B, N) integer labels. Returns f32 array (1,)."""
    B, N, C = y_hat.shape
    assert C == 3, "GlobalCrossEntropy kernel is specialized to 3 classes"

    # Class-major presentation -- the only wrapper relayout: (B, N, 3) -> (3, B, N), native dtype.
    # TODO(synk): if the producer can emit class-major logits directly, feed them here and skip
    # this transpose copy entirely.
    logits = jnp.transpose(y_hat, (2, 0, 1))
    # int8 labels (values 0..2) cut label HBM traffic 4x; keep int32 on the tiny single-block path.
    label_dtype = jnp.int8 if B > 32 else jnp.int32
    labels = y.astype(label_dtype)

    rows, need_mask = _choose_rows(B)
    num_blocks = pl.cdiv(B, rows)

    kernel = functools.partial(_gce_kernel, batch=B, rows=rows, need_mask=need_mask)

    L = B * N
    cost = pl.CostEstimate(
        flops=14 * L,                 # maxes / subs / adds / compares / selects per position
        transcendentals=4 * L,        # 3 exp + 1 log per position
        bytes_accessed=int(logits.size) * logits.dtype.itemsize
        + int(labels.size) * labels.dtype.itemsize
        + num_blocks * N * 4,
    )

    partials = pl.pallas_call(
        kernel,
        out_shape=jax.ShapeDtypeStruct((num_blocks, 1, N), jnp.float32),
        grid_spec=pltpu.PrefetchScalarGridSpec(
            num_scalar_prefetch=0,
            grid=(num_blocks,),
            in_specs=[
                pl.BlockSpec((C, rows, N), lambda i: (0, i, 0)),
                pl.BlockSpec((rows, N), lambda i: (i, 0)),
            ],
            out_specs=pl.BlockSpec((1, 1, N), lambda i: (i, 0, 0)),
        ),
        compiler_params=pltpu.CompilerParams(dimension_semantics=("parallel",)),
        cost_estimate=cost,
    )(logits, labels)

    # Finish: cross-lane / cross-block sum of the partials, scaled by 1/N (per-item mean).
    loss = jnp.sum(partials) * (1.0 / N)
    return loss.reshape(1).astype(jnp.float32)


def _reference(y_hat, y):
    # pure-JAX reference (same math as the PyTorch module), f32 accumulation
    logits = y_hat.astype(jnp.float32)
    lse = jax.scipy.special.logsumexp(logits, axis=-1)
    picked = jnp.take_along_axis(logits, y[..., None].astype(jnp.int32), axis=-1)[..., 0]
    return jnp.sum(jnp.mean(lse - picked, axis=-1)).reshape(1).astype(jnp.float32)


if __name__ == "__main__":
    key = jax.random.PRNGKey(0)
    k1, k2, k3, k4, k5, k6 = jax.random.split(key, 6)

    # documented module shapes, small batch (single full-extent block)
    B, N, C = 2, 225, 3
    y_hat = jax.random.normal(k1, (B, N, C), dtype=jnp.float32)
    y = jax.random.randint(k2, (B, N), 0, C, dtype=jnp.int32)
    loss = global_cross_entropy(y_hat, y)
    jax.block_until_ready(loss)
    ref = _reference(y_hat, y)
    assert loss.shape == (1,)
    assert jnp.allclose(loss, ref, rtol=1e-5, atol=1e-5), (loss, ref)

    # multi-block path: 2 parallel grid steps (v7x dual-TC), int8 labels; f32 and bf16 logits
    B2 = 64
    y_hat2 = jax.random.normal(k3, (B2, N, C), dtype=jnp.float32)
    y2 = jax.random.randint(k4, (B2, N), 0, C, dtype=jnp.int32)
    loss2 = global_cross_entropy(y_hat2, y2)
    jax.block_until_ready(loss2)
    ref2 = _reference(y_hat2, y2)
    assert jnp.allclose(loss2, ref2, rtol=1e-5, atol=1e-4), (loss2, ref2)

    loss_bf16 = global_cross_entropy(y_hat2.astype(jnp.bfloat16), y2)
    jax.block_until_ready(loss_bf16)
    ref_bf16 = _reference(y_hat2.astype(jnp.bfloat16), y2)
    assert jnp.allclose(loss_bf16, ref_bf16, rtol=1e-3, atol=1e-3), (loss_bf16, ref_bf16)

    # ragged last block (B=50 -> 2 blocks of 32 rows): exercises the in-kernel sublane mask
    B3 = 50
    y_hat3 = jax.random.normal(k5, (B3, N, C), dtype=jnp.float32)
    y3 = jax.random.randint(k6, (B3, N), 0, C, dtype=jnp.int32)
    loss3 = global_cross_entropy(y_hat3, y3)
    jax.block_until_ready(loss3)
    ref3 = _reference(y_hat3, y3)
    assert jnp.allclose(loss3, ref3, rtol=1e-5, atol=1e-4), (loss3, ref3)

    print("KERNEL_OK")
</pallas_src>

<mosaic_0001>
module attributes {stable_mosaic.version = 11 : i64} {
  func.func @_gce_kernel(%arg0: i32, %arg1: memref<3x2x225xf32, #tpu.memory_space<vmem>>, %arg2: memref<2x225xi32, #tpu.memory_space<vmem>>, %arg3: memref<1x1x225xf32, #tpu.memory_space<vmem>>) attributes {dimension_semantics = [#tpu.dimension_semantics<parallel>], iteration_bounds = array<i64: 1>, scalar_prefetch = 0 : i64, scratch_operands = 0 : i64, tpu.core_type = #tpu.core_type<tc>, window_params = [{transform_indices = @transform_0, window_bounds = array<i64: 3, 2, 225>}, {transform_indices = @transform_1, window_bounds = array<i64: 2, 225>}, {transform_indices = @transform_2, window_bounds = array<i64: 1, 1, 225>}]} {
    %c0 = arith.constant 0 : index
    %c0_0 = arith.constant 0 : index
    %c0_1 = arith.constant 0 : index
    %0 = vector.load %arg1[%c0, %c0_0, %c0_1] : memref<3x2x225xf32, #tpu.memory_space<vmem>>, vector<1x2x225xf32>
    %1 = vector.shape_cast %0 : vector<1x2x225xf32> to vector<2x225xf32>
    %c1 = arith.constant 1 : index
    %c0_2 = arith.constant 0 : index
    %c0_3 = arith.constant 0 : index
    %2 = vector.load %arg1[%c1, %c0_2, %c0_3] : memref<3x2x225xf32, #tpu.memory_space<vmem>>, vector<1x2x225xf32>
    %3 = vector.shape_cast %2 : vector<1x2x225xf32> to vector<2x225xf32>
    %c2 = arith.constant 2 : index
    %c0_4 = arith.constant 0 : index
    %c0_5 = arith.constant 0 : index
    %4 = vector.load %arg1[%c2, %c0_4, %c0_5] : memref<3x2x225xf32, #tpu.memory_space<vmem>>, vector<1x2x225xf32>
    %5 = vector.shape_cast %4 : vector<1x2x225xf32> to vector<2x225xf32>
    %c0_6 = arith.constant 0 : index
    %c0_7 = arith.constant 0 : index
    %6 = vector.load %arg2[%c0_6, %c0_7] : memref<2x225xi32, #tpu.memory_space<vmem>>, vector<2x225xi32>
    %7 = arith.maximumf %1, %3 : vector<2x225xf32>
    %8 = arith.maximumf %7, %5 : vector<2x225xf32>
    %9 = arith.subf %1, %8 : vector<2x225xf32>
    %10 = math.exp %9 : vector<2x225xf32>
    %11 = arith.subf %3, %8 : vector<2x225xf32>
    %12 = math.exp %11 : vector<2x225xf32>
    %13 = arith.addf %10, %12 : vector<2x225xf32>
    %14 = arith.subf %5, %8 : vector<2x225xf32>
    %15 = math.exp %14 : vector<2x225xf32>
    %16 = arith.addf %13, %15 : vector<2x225xf32>
    %17 = math.log %16 : vector<2x225xf32>
    %18 = arith.addf %8, %17 : vector<2x225xf32>
    %c0_i32 = arith.constant 0 : i32
    %19 = vector.broadcast %c0_i32 : i32 to vector<2x225xi32>
    %20 = arith.cmpi eq, %6, %19 : vector<2x225xi32>
    %c1_i32 = arith.constant 1 : i32
    %21 = vector.broadcast %c1_i32 : i32 to vector<2x225xi32>
    %22 = arith.cmpi eq, %6, %21 : vector<2x225xi32>
    %23 = arith.select %22, %3, %5 : vector<2x225xi1>, vector<2x225xf32>
    %24 = arith.select %20, %1, %23 : vector<2x225xi1>, vector<2x225xf32>
    %25 = arith.subf %18, %24 : vector<2x225xf32>
    %cst = arith.constant dense<0.000000e+00> : vector<225xf32>
    %26 = vector.multi_reduction <add>, %25, %cst [0] : vector<2x225xf32> to vector<225xf32>
    %27 = vector.shape_cast %26 : vector<225xf32> to vector<1x225xf32>
    %28 = vector.shape_cast %27 : vector<1x225xf32> to vector<1x1x225xf32>
    %c0_8 = arith.constant 0 : index
    %c0_9 = arith.constant 0 : index
    %c0_10 = arith.constant 0 : index
    %29 = vector.load %arg3[%c0_8, %c0_9, %c0_10] : memref<1x1x225xf32, #tpu.memory_space<vmem>>, vector<1x1x225xf32>
    tpu.vector_store %arg3[%c0_8, %c0_9, %c0_10], %28 {strides = array<i32>} : memref<1x1x225xf32, #tpu.memory_space<vmem>>, vector<1x1x225xf32>,
    return
  }
  func.func @transform_0(%arg0: i32) -> (i32, i32, i32) {
    %c0_i32 = arith.constant 0 : i32
    %c0_i32_0 = arith.constant 0 : i32
    %c0_i32_1 = arith.constant 0 : i32
    return %c0_i32, %arg0, %c0_i32_0 : i32, i32, i32
  }
  func.func @transform_1(%arg0: i32) -> (i32, i32) {
    %c0_i32 = arith.constant 0 : i32
    %c0_i32_0 = arith.constant 0 : i32
    return %arg0, %c0_i32 : i32, i32
  }
  func.func @transform_2(%arg0: i32) -> (i32, i32, i32) {
    %c0_i32 = arith.constant 0 : i32
    %c0_i32_0 = arith.constant 0 : i32
    %c0_i32_1 = arith.constant 0 : i32
    return %arg0, %c0_i32, %c0_i32_0 : i32, i32, i32
  }
}

</mosaic_0001>

<bundles_post_ra>
// kernel: tpu_custom_call.1
= control target key start
LH: loop header
LB: loop body
LE: loop exit
PB: predicated region body
PF: predicated region fallthrough
CT: control target
= control target key end

     0   :  { %7 = vsyncpa [#allocation3], 0  ;;  %s243_s0 = inlined_call_operand.hbm [shape: f32[3,2,225], index: 0, kind: input, shape index: {}]   ;;  %s244_s1 = inlined_call_operand.hbm [shape: s32[2,225], index: 1, kind: input, shape index: {}]   ;;  %s245_s2 = inlined_call_operand.hbm [shape: f32[1,1,225], index: 2, kind: output, shape index: {}]  }
   0x1   :  { %8 = vsyncpa [#allocation6], 0 }
   0x2   :  { %9 = vsyncpa [#allocation4], 0  ;;  %s212_s9 = smov [#allocation2]  }
   0x3   :  { %s15_s10 = sshll.u32 %s212_s9, 4  ;;  %s16_s10 = int_to_ptr.vmem [resolvable:$true] %s15_s10 }
   0x4   :  { %s154_s11 = scalar_lea.vmem %s16_s10, 192  ;;  %p159_p1 = scmp.lt.s32.totalorder %s16_s10, %s16_s10 }
   0x5   :  { %p155_p0 = scmp.ne.s32.totalorder %s16_s10, %s154_s11  ;;  %p160_p2 = scmp.lt.s32.totalorder %s154_s11, %s154_s11 }
   0x7   :  { %p161_p3 = por %p160_p2, %p159_p1 }
   0x9   :  { %p162_p4 = pnand %p161_p3, %p155_p0 }
   0xb   :  { %165 = shalt.err (!%p162_p4)
}
   0xc   :  { %s213_s12 = smov 64   ;;  %s214_s13 = smov 4  }
   0xd   :  { %21 = dma.hbm_to_vmem [thread:$0]  %s243_s0, 192, %s16_s10, [#allocation3], %s213_s12, %s213_s12, %s214_s13  }
   0xe   :  { %s215_s16 = smov [#allocation5]  }
   0xf   :  { %s28_s17 = sshll.u32 %s215_s16, 4  ;;  %s29_s17 = int_to_ptr.vmem [resolvable:$true] %s28_s17 }
  0x10   :  { %s174_s18 = scalar_lea.vmem %s29_s17, 64  ;;  %p179_p6 = scmp.lt.s32.totalorder %s29_s17, %s29_s17 }
  0x11   :  { %p175_p5 = scmp.ne.s32.totalorder %s29_s17, %s174_s18  ;;  %p180_p7 = scmp.lt.s32.totalorder %s174_s18, %s174_s18 }
  0x13   :  { %p181_p8 = por %p180_p7, %p179_p6 }
  0x15   :  { %p182_p9 = pnand %p181_p8, %p175_p5 }
  0x17   :  { %185 = shalt.err (!%p182_p9)
}
  0x18   :  { %31 = dma.hbm_to_vmem [thread:$0]  %s244_s1, 64, %s29_s17, [#allocation6]  }
  0x19   :  { %206 = dma.done.wait [#allocation3], 192  }
  0x1a   :  { %207 = vsyncadd [#allocation3], 4294967104 }
  0x1b   :  { %208 = dma.done.wait [#allocation6], 64  }
  0x1c   :  { %209 = vsyncadd [#allocation6], 4294967232  ;;  %v38_v0 = vld [vmem:[#allocation2] sm:$0xf]  ;;  %v40_v1 = vld [vmem:[#allocation2 + $0x4] sm:$0xf]  ;;  %v69_v19 = vlaneseq }
  0x1d   :  { %v42_v2 = vld [vmem:[#allocation2 + $0x8] sm:$0xf]  ;;  %v44_v3 = vmax.f32 %v38_v0, %v40_v1  ;;  %v43_v16 = vld [vmem:[#allocation5] sm:$0xf]  ;;  %v216_v17 = vmov 1983009808  }
  0x1e   :  { %v67_v18 = vunpack.c.l.s4 %v216_v17  ;;  %vm61_vm0 = vcmp.eq.s32.totalorder %v43_v16, 1  ;;  %vm60_vm1 = vcmp.eq.s32.totalorder %v43_v16, 0  ;;  %v70_v22 = vshrl.u32 %v69_v19, 7  ;;  %s218_s0 = smov [#allocation7]  }
  0x1f   :  { %v45_v4 = vmax.f32 %v44_v3, %v42_v2  ;;  %v62_v20 = vsel %vm61_vm0, %v40_v1, %v42_v2  ;;  %vm76_vm2 = vcmask 1041408   ;;  %vm84_vm3 = vcmask 787456   ;;  %s121_s1 = sshll.u32 %s218_s0, 4  ;;  %s122_s1 = int_to_ptr.vmem [resolvable:$true] %s121_s1 }
  0x20   :  { %v68_v21 = vunpack.c.0.s8 %v67_v18  ;;  %v63_v25 = vsel %vm60_vm1, %v38_v0, %v62_v20  ;;  %v217_v38 = vmov 1966171168   ;;  %vm112_vm4 = vcmp.lt.s32.totalorder %v69_v19, 225  ;;  %s186_s21 = scalar_lea.vmem %s122_s1, 32  ;;  %p191_p11 = scmp.lt.s32.totalorder %s122_s1, %s122_s1 }
  0x21   :  { %v46_v5 = vsub.f32 %v38_v0, %v45_v4  ;;  %v49_v6 = vsub.f32 %v40_v1, %v45_v4  ;;  %v53_v7 = vsub.f32 %v42_v2, %v45_v4  ;;  %v96_v39 = vunpack.c.l.s4 %v217_v38  ;;  %p187_p10 = scmp.ne.s32.totalorder %s122_s1, %s186_s21  ;;  %p192_p12 = scmp.lt.s32.totalorder %s186_s21, %s186_s21 }
  0x22   :  { %v71_v27 = vsub.s32 %v68_v21, %v70_v22 }
  0x23   :  { %v47_v8 = vmul.f32 1.442695, %v46_v5  ;;  %v50_v9 = vmul.f32 1.442695, %v49_v6  ;;  %v54_v10 = vmul.f32 1.442695, %v53_v7  ;;  %v97_v44 = vunpack.c.0.s8 %v96_v39  ;;  %p193_p13 = por %p192_p12, %p191_p11 }
  0x25   :  { %138 = vpow2.f32 %v47_v8  ;;  %v100_v48 = vsub.s32 %v97_v44, %v70_v22  ;;  %p194_p0 = pnand %p193_p13, %p187_p10 }
  0x26   :  { %140 = vpow2.f32 %v50_v9 }
  0x27   :  { %142 = vpow2.f32 %v54_v10 }
  0x32   :  { %v139_v11 = vpop.eup %138 }
  0x33   :  { %v141_v12 = vpop.eup %140 }
  0x34   :  { %v143_v13 = vpop.eup %142  ;;  %v52_v14 = vadd.f32 %v141_v12, %v139_v11 }
  0x36   :  { %v56_v15 = vadd.f32 %v143_v13, %v52_v14 }
  0x38   :  { %144 = vlog2.f32 %v56_v15 }
  0x45   :  { %v145_v23 = vpop.eup %144 }
  0x46   :  { %v58_v24 = vmul.f32 0.6931472, %v145_v23 }
  0x48   :  { %v59_v26 = vadd.f32 %v58_v24, %v45_v4 }
  0x4a   :  { %v64_v28 = vsub.f32 %v59_v26, %v63_v25 }
  0x4c   :  { %v72_v29 = vrot.slane %v64_v28, %v71_v27 }
  0x4e   :  { %v73_v30 = vcombine.high %v72_v29, %v72_v29  ;;  %v77_v31 = vsel %vm76_vm2, %v72_v29, 0.0 }
  0x4f   :  { %v78_v32 = vrot.slane %v77_v31, 4 }
  0x50   :  { %v85_v33 = vsel %vm84_vm3, %v73_v30, 0.0 }
  0x51   :  { %v79_v34 = vadd.f32 %v78_v32, %v77_v31  ;;  %v86_v35 = vrot.slane %v85_v33, 4 }
  0x53   :  { %v80_v36 = vrot.slane %v79_v34, 2  ;;  %v87_v37 = vadd.f32 %v86_v35, %v85_v33 }
  0x55   :  { %v81_v40 = vadd.f32 %v80_v36, %v79_v34  ;;  %v88_v41 = vrot.slane %v87_v37, 2 }
  0x57   :  { %v82_v42 = vrot.slane %v81_v40, 1  ;;  %v89_v43 = vadd.f32 %v88_v41, %v87_v37 }
  0x59   :  { %v83_v45 = vadd.f32 %v82_v42, %v81_v40  ;;  %v90_v46 = vrot.slane %v89_v43, 1 }
  0x5b   :  { %v91_v47 = vadd.f32 %v90_v46, %v89_v43 }
  0x5d   :  { %v94_v49 = vcombine.low %v83_v45, %v91_v47 }
  0x5f   :  { %v101_v50 = vrot.slane %v94_v49, %v100_v48 }
  0x61   :  { %v108_v51 = vrot.slane %v101_v50, %v100_v48 }
  0x63   :  { %114 = vst.msk [vmem:[#allocation7] sm:$0x3] %vm112_vm4, %v108_v51 }
  0x64   :  { %197 = shalt.err (!%p194_p0)
}
  0x65   :  { %124 = dma.vmem_to_hbm [thread:$0]  %s122_s1, 32, %s245_s2, [#allocation4]  }
  0x66   :  { %210 = dma.done.wait [#allocation4], 32  }
  0x67   :  { %211 = vsyncadd [#allocation4], 4294967264 }
  0x68   :  { %128 = vsyncpa [#allocation3], 1 }
  0x69   :  { %129 = vsyncpa [#allocation6], 1 }
  0x6a   :  { %130 = vsyncpa [#allocation4], 1 }

</bundles_post_ra>
